<compile_context>
chip_gen: v7x
topology: tpu7x:2x2x1
jax: 0.10.0
libtpu: 0.0.40
codegen_flags: <defaults>
</compile_context>

<pallas_src>
import math

import jax
import jax.numpy as jnp
from jax.experimental import pallas as pl
from jax.experimental.pallas import tpu as pltpu

EPS = 1e-6
_HALF_LOG_2PI = 0.5 * math.log(2.0 * math.pi)


def _normal_logpdf_kernel(y_ref, p_ref, o_ref):
    # p_ref rows: 0 -> m, 1 -> a = -0.5/scale^2, 2 -> c = -(log(scale)+0.5*log(2*pi)).
    yf = y_ref[...].astype(jnp.float32)
    m = p_ref[0:1, :]
    a = p_ref[1:2, :]
    c = p_ref[2:3, :]
    diff = yf - m
    o_ref[...] = (diff * diff * a + c).astype(o_ref.dtype)


def _choose_tiles(B, L, in_itemsize, out_itemsize, target_block_bytes):
    """Pick (tb, tn): lane-dense, (8,128)-aligned (or full-dim) blocks of ~target bytes."""
    if L % 128 == 0:
        tn = min(L, 2048)
    else:
        tn = L                                   # full-dim block satisfies the (8,128) rule
    per_row_bytes = tn * max(in_itemsize, out_itemsize)
    rows = max(8, target_block_bytes // per_row_bytes)
    rows = (rows // 8) * 8
    tb = B if B <= rows else rows                # full-dim block allowed for any B
    # Keep >=4 batch steps when the channel axis has a single tile: feeds both v7x
    # TensorCores and gives the double-buffered pipeline something to overlap.
    n_ctiles = pl.cdiv(L, tn)
    if n_ctiles == 1 and B >= 32:
        max_tb = ((pl.cdiv(B, 4) + 7) // 8) * 8
        tb = min(tb, max_tb)
    return tb, tn


def normal_prop_forward(y, m, s, *, eps=EPS, out_dtype=None,
                        target_block_bytes=8 << 20, vmem_limit_bytes=48 << 20):
    """Log-pdf of Normal(m, softplus(s)+eps) at y.  y: (..., NC); m, s: (NC,)."""
    NC = m.shape[-1]
    assert y.shape[-1] == NC, "last dim of y must match number of channels"
    orig_shape = y.shape
    total = math.prod(orig_shape)
    if out_dtype is None:
        out_dtype = y.dtype                      # keep f32 available for downstream loss math

    # Hoist parameter-only math out of the grid loop (tiny (NC,) computation, f32).
    scale = jax.nn.softplus(s.astype(jnp.float32)) + eps
    a = (-0.5) / (scale * scale)                 # -1 / (2 * scale^2)
    c = -(jnp.log(scale) + _HALF_LOG_2PI)        # per-channel constant offset
    m_f = m.astype(jnp.float32)

    # Layout: lane-dense rows.  For NC % 128 != 0 flatten to width L = lcm(NC, 128)
    # (channels repeat L/NC times per row) so stores are unmasked full-lane vst.
    pad = 0
    reps = 1
    if NC % 128 == 0:
        L = NC
        y2 = y.reshape(-1, NC)
    else:
        L = (NC * 128) // math.gcd(NC, 128)
        if L > 16384:                            # lcm too wide; fall back to full-NC rows
            L = NC
            y2 = y.reshape(-1, NC)
        else:
            reps = L // NC
            flat = y.reshape(-1)
            pad = (-total) % L
            if pad:
                flat = jnp.pad(flat, (0, pad))
            y2 = flat.reshape(-1, L)
    B2 = y2.shape[0]

    if reps > 1:
        m_f = jnp.tile(m_f, reps)
        a = jnp.tile(a, reps)
        c = jnp.tile(c, reps)

    # Pack the three per-channel rows into one resident (8, L) f32 buffer (one DMA).
    params = jnp.zeros((8, L), jnp.float32).at[0].set(m_f).at[1].set(a).at[2].set(c)

    in_itemsize = jnp.dtype(y.dtype).itemsize
    out_itemsize = jnp.dtype(out_dtype).itemsize
    tb, tn = _choose_tiles(B2, L, in_itemsize, out_itemsize, target_block_bytes)

    # Batch axis innermost (fastest) so the (8, tn) parameter tile stays resident.
    grid = (pl.cdiv(L, tn), pl.cdiv(B2, tb))

    out = pl.pallas_call(
        _normal_logpdf_kernel,
        out_shape=jax.ShapeDtypeStruct((B2, L), out_dtype),
        grid_spec=pltpu.PrefetchScalarGridSpec(
            num_scalar_prefetch=0,
            grid=grid,
            in_specs=[
                pl.BlockSpec((tb, tn), lambda j, i: (i, j)),  # y tile (streamed, native dtype)
                pl.BlockSpec((8, tn), lambda j, i: (0, j)),   # packed m/a/c   (resident)
            ],
            out_specs=pl.BlockSpec((tb, tn), lambda j, i: (i, j)),
        ),
        compiler_params=pltpu.CompilerParams(
            dimension_semantics=("parallel", "parallel"),
            vmem_limit_bytes=vmem_limit_bytes,
        ),
    )(y2, params)

    if reps > 1:
        out = out.reshape(-1)
        if pad:
            out = out[:total]
    return out.reshape(orig_shape)


def normal_prop_reference(y, m, s, eps=EPS):
    y = y.astype(jnp.float32)
    scale = jax.nn.softplus(s.astype(jnp.float32)) + eps
    return -((y - m) ** 2) / (2.0 * scale ** 2) - jnp.log(scale) - _HALF_LOG_2PI


if __name__ == "__main__":
    key = jax.random.PRNGKey(0)
    k_m, k_s, k_y, k_m2, k_s2, k_y2, k_y3 = jax.random.split(key, 7)

    # Small shapes consistent with the module: nc channels, batch of evaluation points.
    nc, B = 4, 2
    m = jax.random.normal(k_m, (nc,), dtype=jnp.float32)   # nn.Parameter(torch.randn(nc))
    s = jax.random.normal(k_s, (nc,), dtype=jnp.float32)   # nn.Parameter(torch.randn(nc))
    y = jax.random.normal(k_y, (B, nc), dtype=jnp.float32)

    out = jax.block_until_ready(normal_prop_forward(y, m, s))
    ref = normal_prop_reference(y, m[None, :], s[None, :])
    assert out.shape == (B, nc)
    assert jnp.allclose(out, ref, atol=1e-5, rtol=1e-5), "mismatch vs reference (small nc=4)"

    # Lane-aligned channels + multi-step batch grid (exercises the tiled path).
    B2, nc2 = 512, 256
    m2 = jax.random.normal(k_m2, (nc2,), dtype=jnp.float32)
    s2 = jax.random.normal(k_s2, (nc2,), dtype=jnp.float32)
    y2 = jax.random.normal(k_y2, (B2, nc2), dtype=jnp.float32)
    out2 = jax.block_until_ready(
        normal_prop_forward(y2, m2, s2, target_block_bytes=128 * 1024))
    ref2 = normal_prop_reference(y2, m2[None, :], s2[None, :])
    assert out2.shape == (B2, nc2)
    assert jnp.allclose(out2, ref2, atol=1e-5, rtol=1e-5), "mismatch vs reference (tiled)"

    # Native bf16 I/O path (halves HBM traffic vs the old wrapper f32 cast).
    B3, nc3 = 64, 128
    y3 = jax.random.normal(k_y3, (B3, nc3), dtype=jnp.bfloat16)
    out3 = jax.block_until_ready(normal_prop_forward(y3, m2[:nc3], s2[:nc3]))
    assert out3.dtype == jnp.bfloat16 and out3.shape == (B3, nc3)
    ref3 = normal_prop_reference(y3, m2[None, :nc3], s2[None, :nc3])
    assert jnp.allclose(out3.astype(jnp.float32), ref3, atol=5e-2, rtol=5e-2), \
        "mismatch vs reference (bf16)"

    print("KERNEL_OK")
</pallas_src>

<mosaic_0001>
module attributes {stable_mosaic.version = 11 : i64} {
  func.func @_normal_logpdf_kernel(%arg0: i32, %arg1: i32, %arg2: memref<1x128xf32, #tpu.memory_space<vmem>>, %arg3: memref<8x128xf32, #tpu.memory_space<vmem>>, %arg4: memref<1x128xf32, #tpu.memory_space<vmem>>) attributes {dimension_semantics = [#tpu.dimension_semantics<parallel>, #tpu.dimension_semantics<parallel>], iteration_bounds = array<i64: 1, 1>, scalar_prefetch = 0 : i64, scratch_operands = 0 : i64, tpu.core_type = #tpu.core_type<tc>, window_params = [{transform_indices = @transform_0, window_bounds = array<i64: 1, 128>}, {transform_indices = @transform_1, window_bounds = array<i64: 8, 128>}, {transform_indices = @transform_2, window_bounds = array<i64: 1, 128>}]} {
    %c0 = arith.constant 0 : index
    %c0_0 = arith.constant 0 : index
    %0 = vector.load %arg2[%c0, %c0_0] : memref<1x128xf32, #tpu.memory_space<vmem>>, vector<1x128xf32>
    %c0_1 = arith.constant 0 : index
    %c0_2 = arith.constant 0 : index
    %1 = vector.load %arg3[%c0_1, %c0_2] : memref<8x128xf32, #tpu.memory_space<vmem>>, vector<1x128xf32>
    %c1 = arith.constant 1 : index
    %c0_3 = arith.constant 0 : index
    %2 = vector.load %arg3[%c1, %c0_3] : memref<8x128xf32, #tpu.memory_space<vmem>>, vector<1x128xf32>
    %c2 = arith.constant 2 : index
    %c0_4 = arith.constant 0 : index
    %3 = vector.load %arg3[%c2, %c0_4] : memref<8x128xf32, #tpu.memory_space<vmem>>, vector<1x128xf32>
    %4 = arith.subf %0, %1 : vector<1x128xf32>
    %5 = arith.mulf %4, %4 : vector<1x128xf32>
    %6 = arith.mulf %5, %2 : vector<1x128xf32>
    %7 = arith.addf %6, %3 : vector<1x128xf32>
    %c0_5 = arith.constant 0 : index
    %c0_6 = arith.constant 0 : index
    %8 = vector.load %arg4[%c0_5, %c0_6] : memref<1x128xf32, #tpu.memory_space<vmem>>, vector<1x128xf32>
    tpu.vector_store %arg4[%c0_5, %c0_6], %7 {strides = array<i32>} : memref<1x128xf32, #tpu.memory_space<vmem>>, vector<1x128xf32>,
    return
  }
  func.func @transform_0(%arg0: i32, %arg1: i32) -> (i32, i32) {
    %c0_i32 = arith.constant 0 : i32
    return %arg1, %arg0 : i32, i32
  }
  func.func @transform_1(%arg0: i32, %arg1: i32) -> (i32, i32) {
    %c0_i32 = arith.constant 0 : i32
    %c0_i32_0 = arith.constant 0 : i32
    return %c0_i32, %arg0 : i32, i32
  }
  func.func @transform_2(%arg0: i32, %arg1: i32) -> (i32, i32) {
    %c0_i32 = arith.constant 0 : i32
    return %arg1, %arg0 : i32, i32
  }
}

</mosaic_0001>

<bundles_post_ra>
// kernel: tpu_custom_call.1
= control target key start
LH: loop header
LB: loop body
LE: loop exit
PB: predicated region body
PF: predicated region fallthrough
CT: control target
= control target key end

     0   :  { %7 = vsyncpa [#allocation3], 0  ;;  %s190_s0 = inlined_call_operand.hbm [shape: f32[1,128], index: 0, kind: input, shape index: {}]   ;;  %s191_s1 = inlined_call_operand.hbm [shape: f32[8,128], index: 1, kind: input, shape index: {}]   ;;  %s192_s2 = inlined_call_operand.hbm [shape: f32[1,128], index: 2, kind: output, shape index: {}]  }
   0x1   :  { %8 = vsyncpa [#allocation6], 0 }
   0x2   :  { %9 = vsyncpa [#allocation4], 0  ;;  %s136_s9 = smov [#allocation2]   ;;  %s137_s11 = smov [#allocation5]  }
   0x3   :  { %s16_s10 = sshll.u32 %s136_s9, 4  ;;  %s26_s12 = sshll.u32 %s137_s11, 4  ;;  %s17_s10 = int_to_ptr.vmem [resolvable:$true] %s16_s10  ;;  %s27_s12 = int_to_ptr.vmem [resolvable:$true] %s26_s12 }
   0x4   :  { %s64_s15 = scalar_lea.hbm %s190_s0, 16 }
   0x5   :  { %p65_p0 = scmp.ne.s32.totalorder %s190_s0, %s64_s15  ;;  %p68_p1 = scmp.lt.u32.totalorder %s64_s15, %s190_s0 }
   0x7   :  { %p70_p2 = pnand %p68_p1, %p65_p0 }
   0x9   :  { %73 = shalt.err (!%p70_p2)
}
   0xa   :  { %s74_s20 = scalar_lea.vmem %s17_s10, 16  ;;  %s78_s21 = scalar_lea.vmem %s17_s10, 32 }
   0xb   :  { %p75_p3 = scmp.ne.s32.totalorder %s17_s10, %s74_s20  ;;  %p79_p4 = scmp.lt.s32.totalorder %s17_s10, %s17_s10 }
   0xc   :  { %p80_p5 = scmp.lt.s32.totalorder %s78_s21, %s74_s20 }
   0xe   :  { %p81_p6 = por %p80_p5, %p79_p4 }
  0x10   :  { %p82_p7 = pnand %p81_p6, %p75_p3 }
  0x12   :  { %85 = shalt.err (!%p82_p7)
}
  0x13   :  { %19 = dma.hbm_to_vmem [thread:$0]  %s190_s0, 16, %s17_s10, [#allocation3]  }
  0x14   :  { %s86_s26 = scalar_lea.hbm %s191_s1, 128 }
  0x15   :  { %p87_p8 = scmp.ne.s32.totalorder %s191_s1, %s86_s26  ;;  %p90_p9 = scmp.lt.u32.totalorder %s86_s26, %s191_s1 }
  0x17   :  { %p92_p10 = pnand %p90_p9, %p87_p8 }
  0x19   :  { %95 = shalt.err (!%p92_p10)
}
  0x1a   :  { %s96_s3 = scalar_lea.vmem %s27_s12, 128  ;;  %p101_p12 = scmp.lt.s32.totalorder %s27_s12, %s27_s12 }
  0x1b   :  { %p97_p11 = scmp.ne.s32.totalorder %s27_s12, %s96_s3  ;;  %p102_p13 = scmp.lt.s32.totalorder %s96_s3, %s96_s3 }
  0x1d   :  { %p103_p0 = por %p102_p13, %p101_p12 }
  0x1f   :  { %p104_p1 = pnand %p103_p0, %p97_p11 }
  0x21   :  { %107 = shalt.err (!%p104_p1)
}
  0x22   :  { %29 = dma.hbm_to_vmem [thread:$0]  %s191_s1, 128, %s27_s12, [#allocation6]  }
  0x23   :  { %130 = dma.done.wait [#allocation3], 16  }
  0x24   :  { %131 = vsyncadd [#allocation3], 4294967280 }
  0x25   :  { %132 = dma.done.wait [#allocation6], 128  }
  0x26   :  { %133 = vsyncadd [#allocation6], 4294967168  ;;  %v36_v0 = vld [vmem:[#allocation2] sm:$0x1]  ;;  %v37_v1 = vld [vmem:[#allocation5] sm:$0x1] }
  0x27   :  { %v40_v2 = vsub.f32 %v36_v0, %v37_v1  ;;  %v38_v3 = vld [vmem:[#allocation5 + $0x1] sm:$0x1]  ;;  %v39_v5 = vld [vmem:[#allocation5 + $0x2] sm:$0x1]  ;;  %s138_s5 = smov [#allocation7]  }
  0x28   :  { %s51_s6 = sshll.u32 %s138_s5, 4  ;;  %s52_s6 = int_to_ptr.vmem [resolvable:$true] %s51_s6 }
  0x29   :  { %v41_v4 = vmul.f32 %v40_v2, %v40_v2  ;;  %s108_s7 = scalar_lea.vmem %s52_s6, 16  ;;  %s112_s8 = scalar_lea.vmem %s52_s6, 32 }
  0x2a   :  { %p109_p2 = scmp.ne.s32.totalorder %s52_s6, %s108_s7  ;;  %p113_p3 = scmp.lt.s32.totalorder %s52_s6, %s52_s6 }
  0x2b   :  { %v42_v6 = vmul.f32 %v41_v4, %v38_v3  ;;  %p114_p4 = scmp.lt.s32.totalorder %s112_s8, %s108_s7 }
  0x2d   :  { %v43_v7 = vadd.f32 %v42_v6, %v39_v5  ;;  %p115_p5 = por %p114_p4, %p113_p3 }
  0x2f   :  { %44 = vst [vmem:[#allocation7] sm:$0x1] %v43_v7  ;;  %p116_p6 = pnand %p115_p5, %p109_p2 }
  0x31   :  { %119 = shalt.err (!%p116_p6)
}
  0x32   :  { %s120_s10 = scalar_lea.hbm %s192_s2, 16 }
  0x33   :  { %p121_p7 = scmp.ne.s32.totalorder %s192_s2, %s120_s10  ;;  %p124_p8 = scmp.lt.u32.totalorder %s120_s10, %s192_s2 }
  0x35   :  { %p126_p9 = pnand %p124_p8, %p121_p7 }
  0x37   :  { %129 = shalt.err (!%p126_p9)
}
  0x38   :  { %54 = dma.vmem_to_hbm [thread:$0]  %s52_s6, 16, %s192_s2, [#allocation4]  }
  0x39   :  { %134 = dma.done.wait [#allocation4], 16  }
  0x3a   :  { %135 = vsyncadd [#allocation4], 4294967280 }
  0x3b   :  { %58 = vsyncpa [#allocation3], 1 }
  0x3c   :  { %59 = vsyncpa [#allocation6], 1 }
  0x3d   :  { %60 = vsyncpa [#allocation4], 1 }

</bundles_post_ra>
